<compile_context>
chip_gen: v6e
topology: v6e:2x2x1
jax: 0.10.0
libtpu: 0.0.40
codegen_flags: <defaults>
</compile_context>

<pallas_src>
import jax
import jax.numpy as jnp
from jax.experimental import pallas as pl
from jax.experimental.pallas import tpu as pltpu


def _round_up(x, m):
    return (x + m - 1) // m * m


# ---------------------------------------------------------------------------
# Kernel 1: hoisted, fused input projection  Y = X @ [W_z|W_r|W_] + [b_z|b_r|b_]
#   X    : (R, E)   f32   (R = S * B_pad, all timesteps at once)
#   Wcat : (E, 3D)  bf16  (stored [in, out])
#   bcat : (1, 3D)  f32
# ---------------------------------------------------------------------------
def _input_proj_kernel(x_ref, w_ref, b_ref, o_ref):
    x = x_ref[...].astype(jnp.bfloat16)
    y = jnp.dot(x, w_ref[...], preferred_element_type=jnp.float32)
    o_ref[...] = y + b_ref[...]


def input_proj(x2d, w_bf16, b_f32):
    R, E = x2d.shape
    N = w_bf16.shape[1]
    tm = R if R <= 512 else 512          # R is always a multiple of 8 (padded B)
    grid = (pl.cdiv(R, tm),)
    return pl.pallas_call(
        _input_proj_kernel,
        out_shape=jax.ShapeDtypeStruct((R, N), jnp.float32),
        grid_spec=pltpu.PrefetchScalarGridSpec(
            num_scalar_prefetch=0,
            grid=grid,
            in_specs=[
                pl.BlockSpec((tm, E), lambda i: (i, 0)),
                pl.BlockSpec((E, N), lambda i: (0, 0)),
                pl.BlockSpec((1, N), lambda i: (0, 0)),
            ],
            out_specs=pl.BlockSpec((tm, N), lambda i: (i, 0)),
        ),
        compiler_params=pltpu.CompilerParams(
            dimension_semantics=("parallel",)),
    )(x2d, w_bf16, b_f32)


# ---------------------------------------------------------------------------
# Kernel 2: sequential GRU scan over time.  grid=(S,), h lives in VMEM scratch.
#   xproj  : (S, Bp, 3D) f32   precomputed [W_z x | W_r x | W_ x] (+ biases)
#   Uzr_w  : (D, 2D) bf16, Uzr_b: (1, 2D) f32     ([U_z | U_r])
#   Us_w   : (D, D)  bf16, Us_b : (1, D)  f32
#   states : (S, Bp, D) f32
# ---------------------------------------------------------------------------
def _gru_scan_kernel(xp_ref, uzr_w_ref, uzr_b_ref, us_w_ref, us_b_ref,
                     states_ref, h_ref):
    t = pl.program_id(0)

    @pl.when(t == 0)
    def _():
        h_ref[...] = jnp.zeros_like(h_ref)

    D = h_ref.shape[-1]
    h = h_ref[...]                                   # (Bp, D) f32
    xp = xp_ref[0]                                   # (Bp, 3D) f32, [z | r | s]

    gh = jnp.dot(h.astype(jnp.bfloat16), uzr_w_ref[...],
                 preferred_element_type=jnp.float32) + uzr_b_ref[...]    # (Bp, 2D)

    z = jax.nn.sigmoid(xp[:, 0:D] + gh[:, 0:D])
    r = jax.nn.sigmoid(xp[:, D:2 * D] + gh[:, D:2 * D])

    gs = jnp.dot((r * h).astype(jnp.bfloat16), us_w_ref[...],
                 preferred_element_type=jnp.float32) + us_b_ref[...]     # (Bp, D)
    h_new = jnp.tanh(xp[:, 2 * D:3 * D] + gs)

    h_out = (1.0 - z) * h + z * h_new
    h_ref[...] = h_out
    states_ref[0] = h_out


def gru_scan(xproj, uzr_w, uzr_b, us_w, us_b):
    S, Bp, threeD = xproj.shape
    D = threeD // 3
    return pl.pallas_call(
        _gru_scan_kernel,
        out_shape=jax.ShapeDtypeStruct((S, Bp, D), jnp.float32),
        grid_spec=pltpu.PrefetchScalarGridSpec(
            num_scalar_prefetch=0,
            grid=(S,),
            in_specs=[
                pl.BlockSpec((1, Bp, threeD), lambda t: (t, 0, 0)),
                pl.BlockSpec((D, 2 * D), lambda t: (0, 0)),
                pl.BlockSpec((1, 2 * D), lambda t: (0, 0)),
                pl.BlockSpec((D, D), lambda t: (0, 0)),
                pl.BlockSpec((1, D), lambda t: (0, 0)),
            ],
            out_specs=pl.BlockSpec((1, Bp, D), lambda t: (t, 0, 0)),
            scratch_shapes=[pltpu.VMEM((Bp, D), jnp.float32)],
        ),
        compiler_params=pltpu.CompilerParams(
            dimension_semantics=("arbitrary",)),   # recurrence: strictly sequential
    )(xproj, uzr_w, uzr_b, us_w, us_b)


# ---------------------------------------------------------------------------
# Encoder forward (kernel path)
# ---------------------------------------------------------------------------
def encoder_forward(x, kernel_layers):
    """x: (B, S, dim_embed) f32. Returns (states (B,S,D), states[:, -1, :])."""
    B, S, _ = x.shape
    Bp = _round_up(max(B, 8), 8)                  # sublane-dense batch
    if Bp != B:
        x = jnp.pad(x, ((0, Bp - B), (0, 0), (0, 0)))
    inp = jnp.transpose(x, (1, 0, 2))             # time-major (S, Bp, E)
    for kp in kernel_layers:
        e_in = inp.shape[-1]
        proj = input_proj(inp.reshape(S * Bp, e_in), kp["Wcat_w"], kp["Wcat_b"])
        proj = proj.reshape(S, Bp, proj.shape[-1])
        inp = gru_scan(proj, kp["Uzr_w"], kp["Uzr_b"], kp["Us_w"], kp["Us_b"])
    states = jnp.transpose(inp, (1, 0, 2))[:B]    # (B, S, D)
    return states, states[:, -1, :]


# ---------------------------------------------------------------------------
# Parameters
# ---------------------------------------------------------------------------
def init_encoder_params(key, dim_model, dim_embed, num_layers):
    """Per-layer per-gate weights, PyTorch nn.Linear init, stored as [in, out]."""
    layers = []
    e_in = dim_embed
    for _ in range(num_layers):
        p = {}
        for gate, fan_in in (("Wz", e_in), ("Wr", e_in), ("Ws", e_in),
                             ("Uz", dim_model), ("Ur", dim_model), ("Us", dim_model)):
            key, kw, kb = jax.random.split(key, 3)
            bound = 1.0 / (fan_in ** 0.5)
            p[gate + "_w"] = jax.random.uniform(
                kw, (fan_in, dim_model), jnp.float32, -bound, bound)
            p[gate + "_b"] = jax.random.uniform(
                kb, (1, dim_model), jnp.float32, -bound, bound)
        layers.append(p)
        e_in = dim_model          # non-bidirectional: next-layer input = dim_model
    return layers


def prep_kernel_params(layers):
    """Fuse per-gate weights ([z|r|s]) and cast matmul operands to bf16."""
    out = []
    for p in layers:
        out.append({
            "Wcat_w": jnp.concatenate(
                [p["Wz_w"], p["Wr_w"], p["Ws_w"]], axis=1).astype(jnp.bfloat16),
            "Wcat_b": jnp.concatenate([p["Wz_b"], p["Wr_b"], p["Ws_b"]], axis=1),
            "Uzr_w": jnp.concatenate(
                [p["Uz_w"], p["Ur_w"]], axis=1).astype(jnp.bfloat16),
            "Uzr_b": jnp.concatenate([p["Uz_b"], p["Ur_b"]], axis=1),
            "Us_w": p["Us_w"].astype(jnp.bfloat16),
            "Us_b": p["Us_b"],
        })
    return out


# ---------------------------------------------------------------------------
# Pure-JAX reference mirroring the PyTorch forward
# ---------------------------------------------------------------------------
def _gru_layer_ref(x, p, matmul_dtype):
    B, S, _ = x.shape
    D = p["Uz_w"].shape[0]

    def lin(a, w, b):
        return jnp.dot(a.astype(matmul_dtype), w.astype(matmul_dtype),
                       preferred_element_type=jnp.float32) + b

    def step(h, xt):
        r = jax.nn.sigmoid(lin(xt, p["Wr_w"], p["Wr_b"]) + lin(h, p["Ur_w"], p["Ur_b"]))
        z = jax.nn.sigmoid(lin(xt, p["Wz_w"], p["Wz_b"]) + lin(h, p["Uz_w"], p["Uz_b"]))
        h_new = jnp.tanh(lin(xt, p["Ws_w"], p["Ws_b"]) + lin(r * h, p["Us_w"], p["Us_b"]))
        h = (1.0 - z) * h + z * h_new
        return h, h

    h0 = jnp.zeros((B, D), jnp.float32)
    _, states = jax.lax.scan(step, h0, jnp.transpose(x, (1, 0, 2)))
    return jnp.transpose(states, (1, 0, 2))       # (B, S, D)


def encoder_reference(x, layers, matmul_dtype=jnp.float32):
    inp = x
    for p in layers:
        inp = _gru_layer_ref(inp, p, matmul_dtype)
    return inp, inp[:, -1, :]


if __name__ == "__main__":
    dim_model = 32
    dim_embed = 32
    batch = 2
    max_seq = 8
    num_layers = 2

    key = jax.random.PRNGKey(0)
    key, kx, kp = jax.random.split(key, 3)
    x = jax.random.normal(kx, (batch, max_seq, dim_embed), jnp.float32)

    layers = init_encoder_params(kp, dim_model, dim_embed, num_layers)
    klayers = prep_kernel_params(layers)

    fwd = jax.jit(lambda xx: encoder_forward(xx, klayers))
    states, last = jax.block_until_ready(fwd(x))

    assert states.shape == (batch, max_seq, dim_model)
    assert last.shape == (batch, dim_model)

    # Tight check vs a reference that applies the same bf16-matmul policy.
    states_bf, last_bf = encoder_reference(x, layers, matmul_dtype=jnp.bfloat16)
    assert jnp.allclose(states, states_bf, atol=2e-3, rtol=2e-3), "mismatch vs bf16 reference"
    assert jnp.allclose(last, last_bf, atol=2e-3, rtol=2e-3), "mismatch vs bf16 reference (last)"

    # Loose semantic check vs the full-f32 PyTorch-equivalent reference
    # (only difference is bf16 rounding of MXU operands).
    states_f32, _ = encoder_reference(x, layers, matmul_dtype=jnp.float32)
    assert jnp.allclose(states, states_f32, atol=5e-2, rtol=5e-2), "mismatch vs f32 reference"

    print("KERNEL_OK")
</pallas_src>

<mosaic_0001>
module attributes {stable_mosaic.version = 11 : i64} {
  func.func @_gru_scan_kernel(%arg0: i32, %arg1: memref<1x8x96xf32, #tpu.memory_space<vmem>>, %arg2: memref<32x64xbf16, #tpu.memory_space<vmem>>, %arg3: memref<1x64xf32, #tpu.memory_space<vmem>>, %arg4: memref<32x32xbf16, #tpu.memory_space<vmem>>, %arg5: memref<1x32xf32, #tpu.memory_space<vmem>>, %arg6: memref<1x8x32xf32, #tpu.memory_space<vmem>>, %arg7: memref<8x32xf32, #tpu.memory_space<vmem>>) attributes {dimension_semantics = [#tpu.dimension_semantics<arbitrary>], iteration_bounds = array<i64: 8>, scalar_prefetch = 0 : i64, scratch_operands = 1 : i64, tpu.core_type = #tpu.core_type<tc>, window_params = [{transform_indices = @transform_0, window_bounds = array<i64: 1, 8, 96>}, {pipeline_mode = #tpu.pipeline_mode<synchronous>, transform_indices = @transform_1, window_bounds = array<i64: 32, 64>}, {pipeline_mode = #tpu.pipeline_mode<synchronous>, transform_indices = @transform_2, window_bounds = array<i64: 1, 64>}, {pipeline_mode = #tpu.pipeline_mode<synchronous>, transform_indices = @transform_3, window_bounds = array<i64: 32, 32>}, {pipeline_mode = #tpu.pipeline_mode<synchronous>, transform_indices = @transform_4, window_bounds = array<i64: 1, 32>}, {transform_indices = @transform_5, window_bounds = array<i64: 1, 8, 32>}]} {
    %c0_i32 = arith.constant 0 : i32
    %0 = arith.cmpi eq, %arg0, %c0_i32 : i32
    %1 = arith.extui %0 : i1 to i32
    %c0_i32_0 = arith.constant 0 : i32
    %2 = arith.cmpi ne, %1, %c0_i32_0 : i32
    scf.if %2 {
      %cst_22 = arith.constant 0.000000e+00 : f32
      %47 = vector.broadcast %cst_22 : f32 to vector<8x32xf32>
      %c0_23 = arith.constant 0 : index
      %c0_24 = arith.constant 0 : index
      %48 = vector.load %arg7[%c0_23, %c0_24] : memref<8x32xf32, #tpu.memory_space<vmem>>, vector<8x32xf32>
      tpu.vector_store %arg7[%c0_23, %c0_24], %47 {strides = array<i32>} : memref<8x32xf32, #tpu.memory_space<vmem>>, vector<8x32xf32>,
    } else {
    }
    %c0 = arith.constant 0 : index
    %c0_1 = arith.constant 0 : index
    %3 = vector.load %arg7[%c0, %c0_1] : memref<8x32xf32, #tpu.memory_space<vmem>>, vector<8x32xf32>
    %c0_2 = arith.constant 0 : index
    %c0_3 = arith.constant 0 : index
    %c0_4 = arith.constant 0 : index
    %4 = vector.load %arg1[%c0_2, %c0_3, %c0_4] : memref<1x8x96xf32, #tpu.memory_space<vmem>>, vector<1x8x96xf32>
    %5 = vector.shape_cast %4 : vector<1x8x96xf32> to vector<8x96xf32>
    %6 = arith.truncf %3 : vector<8x32xf32> to vector<8x32xbf16>
    %c0_5 = arith.constant 0 : index
    %c0_6 = arith.constant 0 : index
    %7 = vector.load %arg2[%c0_5, %c0_6] : memref<32x64xbf16, #tpu.memory_space<vmem>>, vector<32x64xbf16>
    %cst = arith.constant dense<0.000000e+00> : vector<8x64xf32>
    %8 = tpu.matmul %6, %7, %cst {dimension_numbers = #tpu.dot_dimension_numbers<[1], [0], [0], [1], [0, 0, 1, 1], [], []>} : vector<8x32xbf16>, vector<32x64xbf16>, vector<8x64xf32> -> vector<8x64xf32>
    %c0_7 = arith.constant 0 : index
    %c0_8 = arith.constant 0 : index
    %9 = vector.load %arg3[%c0_7, %c0_8] : memref<1x64xf32, #tpu.memory_space<vmem>>, vector<1x64xf32>
    %10 = vector.broadcast %9 : vector<1x64xf32> to vector<8x64xf32>
    %11 = arith.addf %8, %10 : vector<8x64xf32>
    %12 = vector.extract_strided_slice %5 {offsets = [0, 0], sizes = [8, 32], strides = [1, 1]} : vector<8x96xf32> to vector<8x32xf32>
    %13 = vector.extract_strided_slice %11 {offsets = [0, 0], sizes = [8, 32], strides = [1, 1]} : vector<8x64xf32> to vector<8x32xf32>
    %14 = arith.addf %12, %13 : vector<8x32xf32>
    %15 = arith.negf %14 : vector<8x32xf32>
    %16 = math.exp %15 : vector<8x32xf32>
    %cst_9 = arith.constant 1.000000e+00 : f32
    %17 = vector.broadcast %cst_9 : f32 to vector<8x32xf32>
    %18 = arith.addf %17, %16 : vector<8x32xf32>
    %19 = arith.divf %17, %18 : vector<8x32xf32>
    %20 = vector.extract_strided_slice %5 {offsets = [0, 32], sizes = [8, 32], strides = [1, 1]} : vector<8x96xf32> to vector<8x32xf32>
    %21 = vector.extract_strided_slice %11 {offsets = [0, 32], sizes = [8, 32], strides = [1, 1]} : vector<8x64xf32> to vector<8x32xf32>
    %22 = arith.addf %20, %21 : vector<8x32xf32>
    %23 = arith.negf %22 : vector<8x32xf32>
    %24 = math.exp %23 : vector<8x32xf32>
    %cst_10 = arith.constant 1.000000e+00 : f32
    %25 = vector.broadcast %cst_10 : f32 to vector<8x32xf32>
    %26 = arith.addf %25, %24 : vector<8x32xf32>
    %27 = arith.divf %25, %26 : vector<8x32xf32>
    %28 = arith.mulf %27, %3 : vector<8x32xf32>
    %29 = arith.truncf %28 : vector<8x32xf32> to vector<8x32xbf16>
    %c0_11 = arith.constant 0 : index
    %c0_12 = arith.constant 0 : index
    %30 = vector.load %arg4[%c0_11, %c0_12] : memref<32x32xbf16, #tpu.memory_space<vmem>>, vector<32x32xbf16>
    %cst_13 = arith.constant dense<0.000000e+00> : vector<8x32xf32>
    %31 = tpu.matmul %29, %30, %cst_13 {dimension_numbers = #tpu.dot_dimension_numbers<[1], [0], [0], [1], [0, 0, 1, 1], [], []>} : vector<8x32xbf16>, vector<32x32xbf16>, vector<8x32xf32> -> vector<8x32xf32>
    %c0_14 = arith.constant 0 : index
    %c0_15 = arith.constant 0 : index
    %32 = vector.load %arg5[%c0_14, %c0_15] : memref<1x32xf32, #tpu.memory_space<vmem>>, vector<1x32xf32>
    %33 = vector.broadcast %32 : vector<1x32xf32> to vector<8x32xf32>
    %34 = arith.addf %31, %33 : vector<8x32xf32>
    %35 = vector.extract_strided_slice %5 {offsets = [0, 64], sizes = [8, 32], strides = [1, 1]} : vector<8x96xf32> to vector<8x32xf32>
    %36 = arith.addf %35, %34 : vector<8x32xf32>
    %37 = math.tanh %36 : vector<8x32xf32>
    %cst_16 = arith.constant 1.000000e+00 : f32
    %38 = vector.broadcast %cst_16 : f32 to vector<8x32xf32>
    %39 = arith.subf %38, %19 : vector<8x32xf32>
    %40 = arith.mulf %39, %3 : vector<8x32xf32>
    %41 = arith.mulf %19, %37 : vector<8x32xf32>
    %42 = arith.addf %40, %41 : vector<8x32xf32>
    %c0_17 = arith.constant 0 : index
    %c0_18 = arith.constant 0 : index
    %43 = vector.load %arg7[%c0_17, %c0_18] : memref<8x32xf32, #tpu.memory_space<vmem>>, vector<8x32xf32>
    tpu.vector_store %arg7[%c0_17, %c0_18], %42 {strides = array<i32>} : memref<8x32xf32, #tpu.memory_space<vmem>>, vector<8x32xf32>,
    %c0_19 = arith.constant 0 : index
    %c0_20 = arith.constant 0 : index
    %c0_21 = arith.constant 0 : index
    %44 = vector.load %arg6[%c0_19, %c0_20, %c0_21] : memref<1x8x32xf32, #tpu.memory_space<vmem>>, vector<1x8x32xf32>
    %45 = vector.shape_cast %44 : vector<1x8x32xf32> to vector<8x32xf32>
    %46 = vector.shape_cast %42 : vector<8x32xf32> to vector<1x8x32xf32>
    tpu.vector_store %arg6[%c0_19, %c0_20, %c0_21], %46 {strides = array<i32>} : memref<1x8x32xf32, #tpu.memory_space<vmem>>, vector<1x8x32xf32>,
    return
  }
  func.func @transform_0(%arg0: i32) -> (i32, i32, i32) {
    %c0_i32 = arith.constant 0 : i32
    %c0_i32_0 = arith.constant 0 : i32
    %c0_i32_1 = arith.constant 0 : i32
    return %arg0, %c0_i32, %c0_i32_0 : i32, i32, i32
  }
  func.func @transform_1(%arg0: i32) -> (i32, i32) {
    %c0_i32 = arith.constant 0 : i32
    %c0_i32_0 = arith.constant 0 : i32
    %c0_i32_1 = arith.constant 0 : i32
    return %c0_i32, %c0_i32_0 : i32, i32
  }
  func.func @transform_2(%arg0: i32) -> (i32, i32) {
    %c0_i32 = arith.constant 0 : i32
    %c0_i32_0 = arith.constant 0 : i32
    %c0_i32_1 = arith.constant 0 : i32
    return %c0_i32, %c0_i32_0 : i32, i32
  }
  func.func @transform_3(%arg0: i32) -> (i32, i32) {
    %c0_i32 = arith.constant 0 : i32
    %c0_i32_0 = arith.constant 0 : i32
    %c0_i32_1 = arith.constant 0 : i32
    return %c0_i32, %c0_i32_0 : i32, i32
  }
  func.func @transform_4(%arg0: i32) -> (i32, i32) {
    %c0_i32 = arith.constant 0 : i32
    %c0_i32_0 = arith.constant 0 : i32
    %c0_i32_1 = arith.constant 0 : i32
    return %c0_i32, %c0_i32_0 : i32, i32
  }
  func.func @transform_5(%arg0: i32) -> (i32, i32, i32) {
    %c0_i32 = arith.constant 0 : i32
    %c0_i32_0 = arith.constant 0 : i32
    %c0_i32_1 = arith.constant 0 : i32
    return %arg0, %c0_i32, %c0_i32_0 : i32, i32, i32
  }
}

module attributes {stable_mosaic.version = 11 : i64} {
  func.func @_input_proj_kernel(%arg0: i32, %arg1: memref<64x32xf32, #tpu.memory_space<vmem>>, %arg2: memref<32x96xbf16, #tpu.memory_space<vmem>>, %arg3: memref<1x96xf32, #tpu.memory_space<vmem>>, %arg4: memref<64x96xf32, #tpu.memory_space<vmem>>) attributes {dimension_semantics = [#tpu.dimension_semantics<parallel>], iteration_bounds = array<i64: 1>, scalar_prefetch = 0 : i64, scratch_operands = 0 : i64, tpu.core_type = #tpu.core_type<tc>, window_params = [{transform_indices = @transform_0, window_bounds = array<i64: 64, 32>}, {pipeline_mode = #tpu.pipeline_mode<synchronous>, transform_indices = @transform_1, window_bounds = array<i64: 32, 96>}, {pipeline_mode = #tpu.pipeline_mode<synchronous>, transform_indices = @transform_2, window_bounds = array<i64: 1, 96>}, {transform_indices = @transform_3, window_bounds = array<i64: 64, 96>}]} {
    %c0 = arith.constant 0 : index
    %c0_0 = arith.constant 0 : index
    %0 = vector.load %arg1[%c0, %c0_0] : memref<64x32xf32, #tpu.memory_space<vmem>>, vector<64x32xf32>
    %1 = arith.truncf %0 : vector<64x32xf32> to vector<64x32xbf16>
    %c0_1 = arith.constant 0 : index
    %c0_2 = arith.constant 0 : index
    %2 = vector.load %arg2[%c0_1, %c0_2] : memref<32x96xbf16, #tpu.memory_space<vmem>>, vector<32x96xbf16>
    %cst = arith.constant dense<0.000000e+00> : vector<64x96xf32>
    %3 = tpu.matmul %1, %2, %cst {dimension_numbers = #tpu.dot_dimension_numbers<[1], [0], [0], [1], [0, 0, 1, 1], [], []>} : vector<64x32xbf16>, vector<32x96xbf16>, vector<64x96xf32> -> vector<64x96xf32>
    %c0_3 = arith.constant 0 : index
    %c0_4 = arith.constant 0 : index
    %4 = vector.load %arg3[%c0_3, %c0_4] : memref<1x96xf32, #tpu.memory_space<vmem>>, vector<1x96xf32>
    %5 = vector.broadcast %4 : vector<1x96xf32> to vector<64x96xf32>
    %6 = arith.addf %3, %5 : vector<64x96xf32>
    %c0_5 = arith.constant 0 : index
    %c0_6 = arith.constant 0 : index
    %7 = vector.load %arg4[%c0_5, %c0_6] : memref<64x96xf32, #tpu.memory_space<vmem>>, vector<64x96xf32>
    tpu.vector_store %arg4[%c0_5, %c0_6], %6 {strides = array<i32>} : memref<64x96xf32, #tpu.memory_space<vmem>>, vector<64x96xf32>,
    return
  }
  func.func @transform_0(%arg0: i32) -> (i32, i32) {
    %c0_i32 = arith.constant 0 : i32
    %c0_i32_0 = arith.constant 0 : i32
    return %arg0, %c0_i32 : i32, i32
  }
  func.func @transform_1(%arg0: i32) -> (i32, i32) {
    %c0_i32 = arith.constant 0 : i32
    %c0_i32_0 = arith.constant 0 : i32
    %c0_i32_1 = arith.constant 0 : i32
    return %c0_i32, %c0_i32_0 : i32, i32
  }
  func.func @transform_2(%arg0: i32) -> (i32, i32) {
    %c0_i32 = arith.constant 0 : i32
    %c0_i32_0 = arith.constant 0 : i32
    %c0_i32_1 = arith.constant 0 : i32
    return %c0_i32, %c0_i32_0 : i32, i32
  }
  func.func @transform_3(%arg0: i32) -> (i32, i32) {
    %c0_i32 = arith.constant 0 : i32
    %c0_i32_0 = arith.constant 0 : i32
    return %arg0, %c0_i32 : i32, i32
  }
}

</mosaic_0001>

<bundles_post_ra>
// kernel: _lambda_.5
= control target key start
LH: loop header
LB: loop body
LE: loop exit
PB: predicated region body
PF: predicated region fallthrough
CT: control target
= control target key end

     0   :  { %s557_s18 = smov 0   ;;  %s602_s0 = inlined_call_operand.vmem [shape: f32[8,8,96], index: 0, kind: input, shape index: {}]   ;;  %s603_s1 = inlined_call_operand.vmem [shape: bf16[32,64], index: 1, kind: input, shape index: {}]   ;;  %s604_s2 = inlined_call_operand.vmem [shape: f32[1,64], index: 2, kind: input, shape index: {}]   ;;  %s605_s3 = inlined_call_operand.vmem [shape: bf16[32,32], index: 3, kind: input, shape index: {}]   ;;  %s606_s4 = inlined_call_operand.vmem [shape: f32[1,32], index: 4, kind: input, shape index: {}]   ;;  %s607_s5 = inlined_call_operand.vmem [shape: f32[8,8,32], index: 5, kind: output, shape index: {}]  }
   0x1 LB: > { %s448_s19 = sadd.s32 4294967295, %s519_s18   ;;  %p452_p0 = scmp.ge.s32.totalorder %s519_s18, 1  ;;  %s519_s18 = sphi %s557_s18, %s15_s18  }
   0x2   : > { %p186_p1 = scmp.lt.s32.totalorder %s519_s18, 9 }
   0x4   : > { %p187_p2 = pnand %p452_p0, %p186_p1 }
   0x5   : > { %p212_p3 = scmp.lt.s32.totalorder (!%p187_p2), %s448_s19, 7  ;;  %p455_p4 = scmp.ne.s32.totalorder (!%p187_p2), %s448_s19, 0 }
   0x6   : > { %190 = sbr.rel (%p187_p2) target bundleno = 822 (0x336), region = 40 }
   0xb   : > { %s213_s20 = scalar_select %p212_p3, %s448_s19, 7 }
   0xc   : > { %224 = sbr.rel (%p455_p4) target bundleno = 19 (0x13), region = 44 }
   0xd   : > { %s453_s21 = sshll.u32 %s213_s20, 3 }
   0xe   : > { %s568_s24 = scalar_lea.vmem %s602_s0, %s453_s21  ;;  %s573_s27 = scalar_lea.vmem %s607_s5, %s453_s21 }
  0x11   : > { %vm225_vm0 = vcmask 261120   ;;  %v521_v0 = vmov 0.0  }
  0x12   : > { %226 = vst.msk [vmem:[#allocation2] sm:$0xff] %vm225_vm0, %v521_v0 }
  0x13 PF: > { %v503_v1 = vld [vmem:[%s603_s1 + $0x8] sm:$0xff]   ;;  %v522_v2 = vmov 0.0   ;;  %v504_v3 = vld [vmem:[%s603_s1] sm:$0xff]   ;;  %vm523_vm1 = vmmov 0   ;;  %s524_s7 = smov 32   ;;  %vm253_vm2 = vcmask 261120  }
  0x14   : > { %473 = vmatprep.subr.bf16.mxu0 %v522_v2  ;;  %481 = vmatprep.subr.bf16.mxu1 %v522_v2  ;;  %v505_v6 = vld [vmem:[%s605_s3 + $0x8] sm:$0xff]   ;;  %v506_v7 = vld [vmem:[%s605_s3] sm:$0xff]   ;;  %s525_s14 = smov 96   ;;  %s526_s17 = smov 64  }
  0x15   : > { %474 = vmatpush3.bf16.msra.mxu0 %v503_v1  ;;  %477 = vmatprep.mubr.msk.bf16.mxu0 %vm523_vm1, %v522_v2  ;;  %v456_v8 = vld [vmem:[%s604_s2] ss:$0 sm:$0xff] }
  0x16   : > { %475 = vmatprep.subr.bf16.mxu0 %v522_v2  ;;  %485 = vmatprep.mubr.msk.bf16.mxu1 %vm523_vm1, %v522_v2  ;;  %v228_v9 = vld [vmem:[%s568_s24] sm:$0xff] }
  0x17   : > { %482 = vmatpush3.bf16.msra.mxu1 %v505_v6  ;;  %v461_v24 = vld [vmem:[%s606_s4] ss:$0 sm:$0xff] }
  0x18   : > { %483 = vmatprep.subr.bf16.mxu1 %v522_v2 }
  0x19   : > { %v227_v4 = vld [vmem:[#allocation2] sm:$0xff]  ;;  %476 = vmatpush3.bf16.msra.mxu0 %v504_v3 }
  0x1a   : > { %305 = vrot.lane.b32.xlu0 %v227_v4, %s524_s7  ;;  %v229_v5 = vpack.c.bf16 %v227_v4, %v227_v4 }
  0x1b   : > { %484 = vmatpush3.bf16.msra.mxu1 %v506_v7 }
  0x1c   : > { %478 = vmatmul.mubr.msk.bf16.vlgmr.msra.gmra.mxu0 %vm253_vm2, %v229_v5 }
  0x8c   : > { %v306_v19 = vpop.permute.xlu0 %305 }
  0xdc   : > { %v291_v10 = vpop.f32.mrf.mxu0 }
  0xdd   : > { %v292_v11 = vadd.f32 %v456_v8, %v291_v10 }
  0xde   : > { %v479_v12 = vpop.f32.mrf.mxu0 }
  0xdf   : > { %v297_v13 = vadd.f32 %v292_v11, %v228_v9 }
  0xe0   : > { %v294_v14 = vpop.f32.mrf.mxu0 }
  0xe1   : > { %v460_v15 = vmul.f32 -1.442695, %v297_v13 }
  0xe2   : > { %v480_v16 = vpop.f32.mrf.mxu0 }
  0xe3   : > { %507 = vpow2.f32 %v460_v15 }
  0xf0   : > { %v508_v17 = vpop.eup %507 }
  0xf1   : > { %v301_v18 = vadd.f32 1.0, %v508_v17 }
  0xf3   : > { %509 = vrcp.f32 %v301_v18 }
 0x100   : > { %v510_v20 = vpop.eup %509 }
 0x101   : > { %v308_v21 = vmul.f32 %v510_v20, %v306_v19  ;;  %v385_v33 = vsub.f32 1.0, %v510_v20 }
 0x103   : > { %v309_v22 = vpack.c.bf16 %v308_v21, %v308_v21  ;;  %v386_v35 = vmul.f32 %v385_v33, %v227_v4 }
 0x105   : > { %322 = vrot.lane.b32.xlu0 %v309_v22, %s525_s14 }
 0x177   : > { %v323_v23 = vpop.permute.xlu0 %322 }
 0x178   : > { %486 = vmatmul.mubr.msk.bf16.vlgmr.msra.gmra.mxu1 %vm253_vm2, %v323_v23 }
 0x238   : > { %v373_v25 = vpop.f32.mrf.mxu1 }
 0x239   : > { %v374_v26 = vadd.f32 %v461_v24, %v373_v25 }
 0x23a   : > { %v487_v27 = vpop.f32.mrf.mxu1 }
 0x23b   : > { %380 = vrot.lane.b32.xlu1 %v374_v26, %s526_s17 }
 0x23c   : > { %v376_v28 = vpop.f32.mrf.mxu1 }
 0x23e   : > { %v488_v29 = vpop.f32.mrf.mxu1 }
 0x2ad   : > { %v381_v30 = vpop.permute.xlu1 %380 }
 0x2ae   : > { %v383_v31 = vadd.f32 %v381_v30, %v228_v9 }
 0x2b0   : > { %511 = vtanh.f32 %v383_v31 }
 0x2bd   : > { %v512_v32 = vpop.eup %511 }
 0x2be   : > { %388 = vrot.lane.b32.xlu1 %v512_v32, %s526_s17 }
 0x330   : > { %v389_v34 = vpop.permute.xlu1 %388 }
 0x331   : > { %v391_v36 = vmul.f32 %v510_v20, %v389_v34 }
 0x333   : > { %v392_v37 = vadd.f32 %v391_v36, %v386_v35 }
 0x335   : > { %393 = vst.msk [vmem:[#allocation2] sm:$0xff] %vm253_vm2, %v392_v37  ;;  %394 = vst.msk [vmem:[%s573_s27] sm:$0xff] %vm253_vm2, %v392_v37 }
 0x336 PF: > { %s15_s18 = sadd.s32 1, %s519_s18  }
 0x337   : > { %p12_p5 = scmp.ge.s32.totalorder %s15_s18, 10  }
 0x339   :  { %14 = sbr.rel (!%p12_p5) target bundleno = 1 (0x1), region = 74 }

// kernel: _lambda_.4
= control target key start
LH: loop header
LB: loop body
LE: loop exit
PB: predicated region body
PF: predicated region fallthrough
CT: control target
= control target key end

     0   :  { %vm50_vm0 = vcmask 261120   ;;  %vm128_vm1 = vcmask 785408   ;;  %s261_s1 = inlined_call_operand.vmem [shape: bf16[32,96], index: 1, kind: input, shape index: {}]   ;;  %s262_s0 = inlined_call_operand.vmem [shape: f32[64,32], index: 0, kind: input, shape index: {}]   ;;  %s263_s2 = inlined_call_operand.vmem [shape: f32[1,96], index: 2, kind: input, shape index: {}]   ;;  %s264_s3 = inlined_call_operand.vmem [shape: f32[64,96], index: 3, kind: output, shape index: {}]  }
   0x1   :  { %v170_v0 = vld [vmem:[%s261_s1 + $0x8] sm:$0xff]   ;;  %v171_v1 = vld [vmem:[%s261_s1] sm:$0xff]   ;;  %v17_v7 = vld [vmem:[%s262_s0 + $0x10] sm:$0xff] }
   0x2   :  { %154 = vmatprep.subr.bf16.mxu0 %v170_v0  ;;  %166 = vmatprep.subr.bf16.mxu1 %v170_v0  ;;  %v15_v2 = vld [vmem:[%s262_s0] sm:$0xff]  ;;  %v16_v3 = vld [vmem:[%s262_s0 + $0x8] sm:$0xff]  ;;  %v18_v8 = vld [vmem:[%s262_s0 + $0x18] sm:$0xff] }
   0x3   :  { %v19_v4 = vld [vmem:[%s262_s0 + $0x20] sm:$0xff]  ;;  %155 = vmatpush3.bf16.msra.mxu0 %v170_v0  ;;  %168 = vmatpush3.bf16.msra.mxu1 %v170_v0  ;;  %v23_v5 = vpack.c.bf16 %v16_v3, %v15_v2  ;;  %v20_v6 = vld [vmem:[%s262_s0 + $0x28] sm:$0xff]  ;;  %v21_v10 = vld [vmem:[%s262_s0 + $0x30] sm:$0xff]  ;;  %v24_v12 = vpack.c.bf16 %v18_v8, %v17_v7 }
   0x4   :  { %156 = vmatprep.subr.bf16.mxu0 %v171_v1  ;;  %167 = vmatprep.subr.bf16.mxu1 %v171_v1  ;;  %v25_v9 = vpack.c.bf16 %v20_v6, %v19_v4  ;;  %v22_v11 = vld [vmem:[%s262_s0 + $0x38] sm:$0xff]  ;;  %v141_v14 = vld [vmem:[%s263_s2] ss:$0 sm:$0xff] }
   0x5   :  { %158 = vmatprep.mubr.msk.bf16.mxu0 %vm50_vm0, %v23_v5  ;;  %v26_v13 = vpack.c.bf16 %v22_v11, %v21_v10 }
   0x6   :  { %162 = vmatprep.mubr.msk.bf16.mxu1 %vm50_vm0, %v25_v9 }
   0x7   :  { %157 = vmatpush3.bf16.msra.mxu0 %v171_v1  ;;  %169 = vmatpush3.bf16.msra.mxu1 %v171_v1 }
   0xa   :  { %159 = vmatmul.mubr.msk.bf16.vlgmr.msra.gmra.mxu0 %vm50_vm0, %v24_v12  ;;  %163 = vmatmul.mubr.msk.bf16.vlgmr.msra.gmra.mxu1 %vm50_vm0, %v26_v13 }
  0xca   :  { %v160_v15 = vpop.f32.mrf.mxu0  ;;  %v164_v16 = vpop.f32.mrf.mxu1 }
  0xcb   :  { %v106_v17 = vadd.f32 %v160_v15, %v141_v14  ;;  %v122_v18 = vadd.f32 %v164_v16, %v141_v14 }
  0xcc   :  { %v97_v19 = vpop.f32.mrf.mxu0  ;;  %v113_v20 = vpop.f32.mrf.mxu1 }
  0xcd   :  { %131 = vst.msk [vmem:[%s264_s3 + $0x10] sm:$0xff] %vm128_vm1, %v106_v17  ;;  %135 = vst.msk [vmem:[%s264_s3 + $0x30] sm:$0xff] %vm128_vm1, %v122_v18  ;;  %v98_v21 = vadd.f32 %v141_v14, %v97_v19  ;;  %v114_v22 = vadd.f32 %v141_v14, %v113_v20 }
  0xce   :  { %v161_v23 = vpop.f32.mrf.mxu0  ;;  %v165_v24 = vpop.f32.mrf.mxu1 }
  0xcf   :  { %129 = vst.msk [vmem:[%s264_s3] sm:$0xff] %vm128_vm1, %v98_v21  ;;  %133 = vst.msk [vmem:[%s264_s3 + $0x20] sm:$0xff] %vm128_vm1, %v114_v22  ;;  %v109_v25 = vadd.f32 %v161_v23, %v141_v14  ;;  %v125_v26 = vadd.f32 %v165_v24, %v141_v14 }
  0xd0   :  { %v100_v27 = vpop.f32.mrf.mxu0  ;;  %v116_v28 = vpop.f32.mrf.mxu1 }
  0xd1   :  { %132 = vst.msk [vmem:[%s264_s3 + $0x18] sm:$0xff] %vm128_vm1, %v109_v25  ;;  %136 = vst.msk [vmem:[%s264_s3 + $0x38] sm:$0xff] %vm128_vm1, %v125_v26  ;;  %v101_v29 = vadd.f32 %v141_v14, %v100_v27  ;;  %v117_v30 = vadd.f32 %v141_v14, %v116_v28 }
  0xd3   :  { %130 = vst.msk [vmem:[%s264_s3 + $0x8] sm:$0xff] %vm128_vm1, %v101_v29  ;;  %134 = vst.msk [vmem:[%s264_s3 + $0x28] sm:$0xff] %vm128_vm1, %v117_v30 }

</bundles_post_ra>
